<compile_context>
chip_gen: v6e
topology: v6e:2x2x1
jax: 0.10.0
libtpu: 0.0.40
codegen_flags: <defaults>
</compile_context>

<pallas_src>
import jax
import jax.numpy as jnp
from jax.experimental import pallas as pl
from jax.experimental.pallas import tpu as pltpu


def _round_up(x, m):
    return ((x + m - 1) // m) * m


def _make_outconv_kernel(c_in, c_out):
    def kernel(x_ref, w_ref, b_ref, o_ref):
        # x_ref: (1, c_in, R, 128)  VMEM tile, full (sublane, lane) planes
        # w_ref: (c_out, c_in)      SMEM scalars
        # b_ref: (c_out,)           SMEM scalars
        # o_ref: (1, c_out, R, 128) VMEM tile
        # Load each input-channel plane once; reuse across output channels.
        xs = [x_ref[0, ci, :, :] for ci in range(c_in)]  # each (R, 128)
        for co in range(c_out):
            acc = xs[0] * w_ref[co, 0]
            for ci in range(1, c_in):
                acc = acc + xs[ci] * w_ref[co, ci]
            acc = acc + b_ref[co]
            o_ref[0, co, :, :] = jax.nn.sigmoid(acc).astype(o_ref.dtype)

    return kernel


def outconv_forward(x_nchw, weight, bias, *, max_tile_rows=256):
    """sigmoid(1x1 conv) matching PyTorch OutConv.forward.

    x_nchw:  (N, C_in, H, W)        float32
    weight:  (C_out, C_in, 1, 1)    PyTorch Conv2d weight layout
    bias:    (C_out,)
    returns: (N, C_out, H, W)
    """
    N, C_in, H, W = x_nchw.shape
    C_out = weight.shape[0]
    HW = H * W

    w2 = weight.reshape(C_out, C_in)
    b1 = bias.reshape(C_out)

    # Lay pixels out as (rows, 128) so VPU ops see full vregs and stores are
    # unmasked.  Pad the pixel axis instead of asserting.
    rows = pl.cdiv(HW, 128)
    if rows <= max_tile_rows:
        tile_rows = rows                     # full extent -> (8,128) rule satisfied
        rows_padded = rows
    else:
        tile_rows = max_tile_rows            # multiple of 8
        rows_padded = _round_up(rows, tile_rows)
    hw_padded = rows_padded * 128

    x3 = x_nchw.reshape(N, C_in, HW)
    if hw_padded != HW:
        x3 = jnp.pad(x3, ((0, 0), (0, 0), (0, hw_padded - HW)))
    x4 = x3.reshape(N, C_in, rows_padded, 128)   # free, contiguous reshape

    grid = (N, rows_padded // tile_rows)

    itemsize = jnp.dtype(x_nchw.dtype).itemsize
    cost = pl.CostEstimate(
        flops=2 * N * HW * C_in * C_out,
        transcendentals=N * HW * C_out,
        bytes_accessed=(x4.size + w2.size + b1.size
                        + N * C_out * rows_padded * 128) * itemsize,
    )

    out4 = pl.pallas_call(
        _make_outconv_kernel(C_in, C_out),
        out_shape=jax.ShapeDtypeStruct((N, C_out, rows_padded, 128),
                                       x_nchw.dtype),
        grid_spec=pltpu.PrefetchScalarGridSpec(
            num_scalar_prefetch=0,
            grid=grid,
            in_specs=[
                pl.BlockSpec((1, C_in, tile_rows, 128),
                             lambda n, t: (n, 0, t, 0)),
                pl.BlockSpec(memory_space=pltpu.MemorySpace.SMEM),  # weights
                pl.BlockSpec(memory_space=pltpu.MemorySpace.SMEM),  # bias
            ],
            out_specs=pl.BlockSpec((1, C_out, tile_rows, 128),
                                   lambda n, t: (n, 0, t, 0)),
        ),
        compiler_params=pltpu.CompilerParams(
            dimension_semantics=("parallel", "parallel")
        ),
        cost_estimate=cost,
    )(x4, w2, b1)

    out3 = out4.reshape(N, C_out, hw_padded)
    if hw_padded != HW:
        out3 = out3[:, :, :HW]
    return out3.reshape(N, C_out, H, W)


if __name__ == "__main__":
    key = jax.random.PRNGKey(0)
    kx, kw, kb = jax.random.split(key, 3)

    N, C_in, C_out, Hh, Ww = 2, 4, 3, 16, 16
    x = jax.random.normal(kx, (N, C_in, Hh, Ww), dtype=jnp.float32)
    # Deterministic synthetic params matching nn.Conv2d(in, out, kernel_size=(1,1))
    weight = jax.random.normal(kw, (C_out, C_in, 1, 1), dtype=jnp.float32) * 0.1
    bias = jax.random.normal(kb, (C_out,), dtype=jnp.float32) * 0.1

    out = outconv_forward(x, weight, bias)
    jax.block_until_ready(out)

    # Reference in plain JAX: sigmoid(1x1 conv), same math as torch.sigmoid(Conv2d(x))
    ref = jax.nn.sigmoid(
        jnp.einsum("nchw,oc->nohw", x, weight.reshape(C_out, C_in))
        + bias[None, :, None, None]
    )
    assert out.shape == (N, C_out, Hh, Ww)
    assert jnp.allclose(out, ref, atol=1e-5, rtol=1e-5)

    print("KERNEL_OK")
</pallas_src>

<mosaic_0001>
module attributes {stable_mosaic.version = 11 : i64} {
  func.func @kernel(%arg0: i32, %arg1: i32, %arg2: memref<1x4x2x128xf32, #tpu.memory_space<vmem>>, %arg3: memref<3x4xf32, #tpu.memory_space<smem>>, %arg4: memref<3xf32, #tpu.memory_space<smem>>, %arg5: memref<1x3x2x128xf32, #tpu.memory_space<vmem>>) attributes {dimension_semantics = [#tpu.dimension_semantics<parallel>, #tpu.dimension_semantics<parallel>], iteration_bounds = array<i64: 2, 1>, scalar_prefetch = 0 : i64, scratch_operands = 0 : i64, tpu.core_type = #tpu.core_type<tc>, window_params = [{transform_indices = @transform_0, window_bounds = array<i64: 1, 4, 2, 128>}, {transform_indices = @transform_1, window_bounds = array<i64: 3, 4>}, {transform_indices = @transform_2, window_bounds = array<i64: 3>}, {transform_indices = @transform_3, window_bounds = array<i64: 1, 3, 2, 128>}]} {
    %c0 = arith.constant 0 : index
    %c0_0 = arith.constant 0 : index
    %c0_1 = arith.constant 0 : index
    %c0_2 = arith.constant 0 : index
    %0 = vector.load %arg2[%c0, %c0_0, %c0_1, %c0_2] : memref<1x4x2x128xf32, #tpu.memory_space<vmem>>, vector<1x1x2x128xf32>
    %1 = vector.shape_cast %0 : vector<1x1x2x128xf32> to vector<2x128xf32>
    %c0_3 = arith.constant 0 : index
    %c1 = arith.constant 1 : index
    %c0_4 = arith.constant 0 : index
    %c0_5 = arith.constant 0 : index
    %2 = vector.load %arg2[%c0_3, %c1, %c0_4, %c0_5] : memref<1x4x2x128xf32, #tpu.memory_space<vmem>>, vector<1x1x2x128xf32>
    %3 = vector.shape_cast %2 : vector<1x1x2x128xf32> to vector<2x128xf32>
    %c0_6 = arith.constant 0 : index
    %c2 = arith.constant 2 : index
    %c0_7 = arith.constant 0 : index
    %c0_8 = arith.constant 0 : index
    %4 = vector.load %arg2[%c0_6, %c2, %c0_7, %c0_8] : memref<1x4x2x128xf32, #tpu.memory_space<vmem>>, vector<1x1x2x128xf32>
    %5 = vector.shape_cast %4 : vector<1x1x2x128xf32> to vector<2x128xf32>
    %c0_9 = arith.constant 0 : index
    %c3 = arith.constant 3 : index
    %c0_10 = arith.constant 0 : index
    %c0_11 = arith.constant 0 : index
    %6 = vector.load %arg2[%c0_9, %c3, %c0_10, %c0_11] : memref<1x4x2x128xf32, #tpu.memory_space<vmem>>, vector<1x1x2x128xf32>
    %7 = vector.shape_cast %6 : vector<1x1x2x128xf32> to vector<2x128xf32>
    %c0_12 = arith.constant 0 : index
    %c0_13 = arith.constant 0 : index
    %8 = memref.load %arg3[%c0_12, %c0_13] : memref<3x4xf32, #tpu.memory_space<smem>>
    %9 = vector.broadcast %8 : f32 to vector<2x128xf32>
    %10 = arith.mulf %1, %9 : vector<2x128xf32>
    %c0_14 = arith.constant 0 : index
    %c1_15 = arith.constant 1 : index
    %11 = memref.load %arg3[%c0_14, %c1_15] : memref<3x4xf32, #tpu.memory_space<smem>>
    %12 = vector.broadcast %11 : f32 to vector<2x128xf32>
    %13 = arith.mulf %3, %12 : vector<2x128xf32>
    %14 = arith.addf %10, %13 : vector<2x128xf32>
    %c0_16 = arith.constant 0 : index
    %c2_17 = arith.constant 2 : index
    %15 = memref.load %arg3[%c0_16, %c2_17] : memref<3x4xf32, #tpu.memory_space<smem>>
    %16 = vector.broadcast %15 : f32 to vector<2x128xf32>
    %17 = arith.mulf %5, %16 : vector<2x128xf32>
    %18 = arith.addf %14, %17 : vector<2x128xf32>
    %c0_18 = arith.constant 0 : index
    %c3_19 = arith.constant 3 : index
    %19 = memref.load %arg3[%c0_18, %c3_19] : memref<3x4xf32, #tpu.memory_space<smem>>
    %20 = vector.broadcast %19 : f32 to vector<2x128xf32>
    %21 = arith.mulf %7, %20 : vector<2x128xf32>
    %22 = arith.addf %18, %21 : vector<2x128xf32>
    %c0_20 = arith.constant 0 : index
    %23 = memref.load %arg4[%c0_20] : memref<3xf32, #tpu.memory_space<smem>>
    %24 = vector.broadcast %23 : f32 to vector<2x128xf32>
    %25 = arith.addf %22, %24 : vector<2x128xf32>
    %26 = arith.negf %25 : vector<2x128xf32>
    %27 = math.exp %26 : vector<2x128xf32>
    %cst = arith.constant 1.000000e+00 : f32
    %28 = vector.broadcast %cst : f32 to vector<2x128xf32>
    %29 = arith.addf %28, %27 : vector<2x128xf32>
    %30 = arith.divf %28, %29 : vector<2x128xf32>
    %c0_21 = arith.constant 0 : index
    %c0_22 = arith.constant 0 : index
    %c0_23 = arith.constant 0 : index
    %c0_24 = arith.constant 0 : index
    %31 = vector.load %arg5[%c0_21, %c0_22, %c0_23, %c0_24] : memref<1x3x2x128xf32, #tpu.memory_space<vmem>>, vector<1x1x2x128xf32>
    %32 = vector.shape_cast %31 : vector<1x1x2x128xf32> to vector<2x128xf32>
    %33 = vector.shape_cast %30 : vector<2x128xf32> to vector<1x1x2x128xf32>
    tpu.vector_store %arg5[%c0_21, %c0_22, %c0_23, %c0_24], %33 {strides = array<i32>} : memref<1x3x2x128xf32, #tpu.memory_space<vmem>>, vector<1x1x2x128xf32>,
    %c1_25 = arith.constant 1 : index
    %c0_26 = arith.constant 0 : index
    %34 = memref.load %arg3[%c1_25, %c0_26] : memref<3x4xf32, #tpu.memory_space<smem>>
    %35 = vector.broadcast %34 : f32 to vector<2x128xf32>
    %36 = arith.mulf %1, %35 : vector<2x128xf32>
    %c1_27 = arith.constant 1 : index
    %c1_28 = arith.constant 1 : index
    %37 = memref.load %arg3[%c1_27, %c1_28] : memref<3x4xf32, #tpu.memory_space<smem>>
    %38 = vector.broadcast %37 : f32 to vector<2x128xf32>
    %39 = arith.mulf %3, %38 : vector<2x128xf32>
    %40 = arith.addf %36, %39 : vector<2x128xf32>
    %c1_29 = arith.constant 1 : index
    %c2_30 = arith.constant 2 : index
    %41 = memref.load %arg3[%c1_29, %c2_30] : memref<3x4xf32, #tpu.memory_space<smem>>
    %42 = vector.broadcast %41 : f32 to vector<2x128xf32>
    %43 = arith.mulf %5, %42 : vector<2x128xf32>
    %44 = arith.addf %40, %43 : vector<2x128xf32>
    %c1_31 = arith.constant 1 : index
    %c3_32 = arith.constant 3 : index
    %45 = memref.load %arg3[%c1_31, %c3_32] : memref<3x4xf32, #tpu.memory_space<smem>>
    %46 = vector.broadcast %45 : f32 to vector<2x128xf32>
    %47 = arith.mulf %7, %46 : vector<2x128xf32>
    %48 = arith.addf %44, %47 : vector<2x128xf32>
    %c1_33 = arith.constant 1 : index
    %49 = memref.load %arg4[%c1_33] : memref<3xf32, #tpu.memory_space<smem>>
    %50 = vector.broadcast %49 : f32 to vector<2x128xf32>
    %51 = arith.addf %48, %50 : vector<2x128xf32>
    %52 = arith.negf %51 : vector<2x128xf32>
    %53 = math.exp %52 : vector<2x128xf32>
    %cst_34 = arith.constant 1.000000e+00 : f32
    %54 = vector.broadcast %cst_34 : f32 to vector<2x128xf32>
    %55 = arith.addf %54, %53 : vector<2x128xf32>
    %56 = arith.divf %54, %55 : vector<2x128xf32>
    %c0_35 = arith.constant 0 : index
    %c1_36 = arith.constant 1 : index
    %c0_37 = arith.constant 0 : index
    %c0_38 = arith.constant 0 : index
    %57 = vector.load %arg5[%c0_35, %c1_36, %c0_37, %c0_38] : memref<1x3x2x128xf32, #tpu.memory_space<vmem>>, vector<1x1x2x128xf32>
    %58 = vector.shape_cast %57 : vector<1x1x2x128xf32> to vector<2x128xf32>
    %59 = vector.shape_cast %56 : vector<2x128xf32> to vector<1x1x2x128xf32>
    tpu.vector_store %arg5[%c0_35, %c1_36, %c0_37, %c0_38], %59 {strides = array<i32>} : memref<1x3x2x128xf32, #tpu.memory_space<vmem>>, vector<1x1x2x128xf32>,
    %c2_39 = arith.constant 2 : index
    %c0_40 = arith.constant 0 : index
    %60 = memref.load %arg3[%c2_39, %c0_40] : memref<3x4xf32, #tpu.memory_space<smem>>
    %61 = vector.broadcast %60 : f32 to vector<2x128xf32>
    %62 = arith.mulf %1, %61 : vector<2x128xf32>
    %c2_41 = arith.constant 2 : index
    %c1_42 = arith.constant 1 : index
    %63 = memref.load %arg3[%c2_41, %c1_42] : memref<3x4xf32, #tpu.memory_space<smem>>
    %64 = vector.broadcast %63 : f32 to vector<2x128xf32>
    %65 = arith.mulf %3, %64 : vector<2x128xf32>
    %66 = arith.addf %62, %65 : vector<2x128xf32>
    %c2_43 = arith.constant 2 : index
    %c2_44 = arith.constant 2 : index
    %67 = memref.load %arg3[%c2_43, %c2_44] : memref<3x4xf32, #tpu.memory_space<smem>>
    %68 = vector.broadcast %67 : f32 to vector<2x128xf32>
    %69 = arith.mulf %5, %68 : vector<2x128xf32>
    %70 = arith.addf %66, %69 : vector<2x128xf32>
    %c2_45 = arith.constant 2 : index
    %c3_46 = arith.constant 3 : index
    %71 = memref.load %arg3[%c2_45, %c3_46] : memref<3x4xf32, #tpu.memory_space<smem>>
    %72 = vector.broadcast %71 : f32 to vector<2x128xf32>
    %73 = arith.mulf %7, %72 : vector<2x128xf32>
    %74 = arith.addf %70, %73 : vector<2x128xf32>
    %c2_47 = arith.constant 2 : index
    %75 = memref.load %arg4[%c2_47] : memref<3xf32, #tpu.memory_space<smem>>
    %76 = vector.broadcast %75 : f32 to vector<2x128xf32>
    %77 = arith.addf %74, %76 : vector<2x128xf32>
    %78 = arith.negf %77 : vector<2x128xf32>
    %79 = math.exp %78 : vector<2x128xf32>
    %cst_48 = arith.constant 1.000000e+00 : f32
    %80 = vector.broadcast %cst_48 : f32 to vector<2x128xf32>
    %81 = arith.addf %80, %79 : vector<2x128xf32>
    %82 = arith.divf %80, %81 : vector<2x128xf32>
    %c0_49 = arith.constant 0 : index
    %c2_50 = arith.constant 2 : index
    %c0_51 = arith.constant 0 : index
    %c0_52 = arith.constant 0 : index
    %83 = vector.load %arg5[%c0_49, %c2_50, %c0_51, %c0_52] : memref<1x3x2x128xf32, #tpu.memory_space<vmem>>, vector<1x1x2x128xf32>
    %84 = vector.shape_cast %83 : vector<1x1x2x128xf32> to vector<2x128xf32>
    %85 = vector.shape_cast %82 : vector<2x128xf32> to vector<1x1x2x128xf32>
    tpu.vector_store %arg5[%c0_49, %c2_50, %c0_51, %c0_52], %85 {strides = array<i32>} : memref<1x3x2x128xf32, #tpu.memory_space<vmem>>, vector<1x1x2x128xf32>,
    return
  }
  func.func @transform_0(%arg0: i32, %arg1: i32) -> (i32, i32, i32, i32) {
    %c0_i32 = arith.constant 0 : i32
    %c0_i32_0 = arith.constant 0 : i32
    %c0_i32_1 = arith.constant 0 : i32
    return %arg0, %c0_i32, %arg1, %c0_i32_0 : i32, i32, i32, i32
  }
  func.func @transform_1(%arg0: i32, %arg1: i32) -> (i32, i32) {
    %c0_i32 = arith.constant 0 : i32
    %c0_i32_0 = arith.constant 0 : i32
    %c0_i32_1 = arith.constant 0 : i32
    return %c0_i32, %c0_i32_0 : i32, i32
  }
  func.func @transform_2(%arg0: i32, %arg1: i32) -> i32 {
    %c0_i32 = arith.constant 0 : i32
    %c0_i32_0 = arith.constant 0 : i32
    return %c0_i32 : i32
  }
  func.func @transform_3(%arg0: i32, %arg1: i32) -> (i32, i32, i32, i32) {
    %c0_i32 = arith.constant 0 : i32
    %c0_i32_0 = arith.constant 0 : i32
    %c0_i32_1 = arith.constant 0 : i32
    return %arg0, %c0_i32, %arg1, %c0_i32_0 : i32, i32, i32, i32
  }
}

</mosaic_0001>

<bundles_post_ra>
// kernel: tpu_custom_call.1
= control target key start
LH: loop header
LB: loop body
LE: loop exit
PB: predicated region body
PF: predicated region fallthrough
CT: control target
= control target key end

     0   :  { %s937_s0 = inlined_call_operand.hbm [shape: f32[2,4,2,128], index: 0, kind: input, shape index: {}]   ;;  %s938_s1 = inlined_call_operand.hbm [shape: f32[3,4], index: 1, kind: input, shape index: {}]   ;;  %s939_s2 = inlined_call_operand.vmem [shape: f32[3], index: 2, kind: input, shape index: {}]   ;;  %s940_s3 = inlined_call_operand.hbm [shape: f32[2,3,2,128], index: 3, kind: output, shape index: {}]  }
   0x1   :  { %942 = sst [smem:[#allocation14_spill]] %s938_s1 }
   0x2   :  { %8 = vsyncpa [#allocation3], 0 }
   0x3   :  { %10 = vsyncpa [#allocation3 + $0x1], 0 }
   0x4   :  { %11 = vsyncpa [#allocation5], 0 }
   0x5   :  { %12 = vsyncpa [#allocation6], 0 }
   0x6   :  { %13 = vsyncpa [#allocation4], 0 }
   0x7   :  { %15 = vsyncpa [#allocation4 + $0x1], 0  ;;  %s750_s12 = smov 0   ;;  %s752_s13 = smov 0  }
   0x8   :  { %s754_s14 = smov 0   ;;  %s756_s15 = smov 0  }
   0x9   :  { %s758_s16 = smov 0   ;;  %s760_s17 = smov 0  }
   0xa LB: > { %s439_s18 = sadd.s32 4294967295, %s720_s17   ;;  %s440_s19 = sadd.s32 4294967294, %s720_s17   ;;  %s720_s17 = sphi %s760_s17, %s21_s17   ;;  %s716_s16 = sphi %s758_s16, %s958_s16   ;;  %s712_s15 = sphi %s756_s15, %s957_s15   ;;  %s708_s14 = sphi %s754_s14, %s956_s14   ;;  %s704_s13 = sphi %s752_s13, %s955_s13   ;;  %s700_s12 = sphi %s750_s12, %s954_s12  }
   0xb   : > { %s42_s20 = sadd.s32 1, %s708_s14  ;;  %p49_p0 = scmp.ne.s32.totalorder %s708_s14, %s704_s13 }
   0xc   : > { %p50_p1 = scmp.eq.s32.totalorder %s720_s17, 0  ;;  %p55_p2 = scmp.ne.s32.totalorder %s704_s13, %s700_s12 }
   0xd   : > { %p788_p3 = scmp.eq.s32.totalorder %s439_s18, 0  ;;  %p123_p4 = scmp.eq.s32.totalorder %s439_s18, 1 }
   0xe   : > { %p51_p5 = por %p50_p1, %p49_p0  ;;  %p129_p6 = scmp.eq.s32.totalorder %s440_s19, 1 }
   0xf   : > { %p794_p7 = por %p788_p3, %p55_p2  ;;  %p798_p8 = por %p123_p4, %p49_p0 }
  0x10   : > { %p802_p9 = por %p129_p6, %p55_p2  ;;  %p441_p10 = scmp.ge.s32.totalorder %s720_s17, 1 }
  0x11   : > { %s945_s23 = scalar_select %p798_p8, 1, 0 }
  0x12   : > { %s946_s24 = scalar_select %p802_p9, 1, 0 }
  0x13   : > { %p136_p11 = scmp.lt.s32.totalorder %s720_s17, 3  ;;  %p508_p1 = scmp.lt.s32.totalorder %s720_s17, 2 }
  0x14   : > { %s158_s28 = sshll.u32 %s939_s2, 4  ;;  %s169_s4 = sand.u32 1, %s708_s14   ;;  %s159_s28 = int_to_ptr.vmem [resolvable:$true] %s158_s28 }
  0x15   : > { %p809_p13 = pnand %p441_p10, %p136_p11  ;;  %p819_p4 = pnand %p508_p1, %p51_p5 }
  0x16   : > { %s33_s5 = sadd.s32 1, %s716_s16  ;;  %s722_s6 = smov [#allocation7]  }
  0x17   : > { %p491_p0 = pneg %p809_p13  ;;  %s950_s1 = sld [smem:[#allocation14_spill]] }
  0x18   : > { %s589_s9 = scalar_lea.vmem %s159_s28, 16  ;;  %p597_p1 = scmp.lt.s32.totalorder %s159_s28, %s159_s28 }
  0x19   : > { %p825_p2 = pnand %p491_p0, %p788_p3  ;;  %p590_p5 = scmp.ne.s32.totalorder %s159_s28, %s589_s9 }
  0x1a   : > { %p598_p0 = scmp.lt.s32.totalorder %s589_s9, %s589_s9 }
  0x1b   : > { %p591_p6 = pneg %p825_p2 }
  0x1c   : > { %p599_p12 = por %p598_p0, %p597_p1 }
  0x1d   : > { %494 = dma.hbm_to_smem (!%p825_p2), %s950_s1, 64, %s722_s6, [#allocation5]  }
  0x1e   : > { %p592_p10 = pnand %p591_p6, %p590_p5 }
  0x20   : > { %p593_p11 = pneg %p592_p10 }
  0x22   : > { %p600_p9 = pnand %p599_p12, %p593_p11 }
  0x24   : > { %603 = shalt.err (!%p600_p9)
}
  0x25   : > { %s723_s10 = smov [#allocation8]   ;;  %p35_p8 = scmp.ge.s32.totalorder %s33_s5, 2 }
  0x26   : > { %497 = dma.vmem_to_smem (!%p825_p2), %s159_s28, 16, %s723_s10, [#allocation6]  }
  0x27   : > { %s445_s11 = sshll.u32 %s169_s4, 3  ;;  %s476_s18 = sshll.u32 %s716_s16, 7 }
  0x28   : > { %s960_s5 = smov (%p35_p8, %s33_s5), 0  ;;  %s180_s27 = scalar_lea.hbm %s937_s0, %s476_s18 }
  0x29   : > { %s37_s6 = ssub.s32 %s716_s16, %s960_s5  ;;  %s173_s7 = scalar_lea.vmem [#allocation2], %s445_s11 }
  0x2a   : > { %s181_s8 = sshll.u32 %s173_s7, 4  ;;  %p40_p9 = scmp.eq.s32.totalorder %s37_s6, 0  ;;  %s182_s8 = int_to_ptr.vmem [resolvable:$true] %s181_s8 }
  0x2b   : > { %s170_s9 = scalar_lea.sflag [#allocation3], %s169_s4  ;;  %p606_p12 = pneg %p819_p4 }
  0x2c   : > { %s851_s30 = scalar_select %p40_p9, %s708_s14, %s42_s20  }
  0x2d   : > { %s617_s28 = scalar_lea.vmem %s182_s8, 128  ;;  %s724_s10 = smov [#allocation2]  }
  0x2e   : > { %p618_p2 = scmp.ne.s32.totalorder %s182_s8, %s617_s28  ;;  %s622_s1 = sshll.u32 %s724_s10, 4  ;;  %s623_s1 = int_to_ptr.vmem [resolvable:$false] %s622_s1 }
  0x2f   : > { %s624_s19 = scalar_lea.vmem %s623_s1, 256  ;;  %p625_p6 = scmp.lt.s32.totalorder %s182_s8, %s623_s1 }
  0x30   : > { %p620_p8 = pnand %p618_p2, %p606_p12  ;;  %p626_p10 = scmp.lt.s32.totalorder %s624_s19, %s617_s28 }
  0x32   : > { %p621_p5 = pneg %p620_p8  ;;  %p627_p11 = por %p626_p10, %p625_p6 }
  0x34   : > { %p628_p1 = pnand %p627_p11, %p621_p5 }
  0x36   : > { %631 = shalt.err (!%p628_p1)
}
  0x37   : > { %s725_s11 = smov 32   ;;  %s726_s20 = smov 2  }
  0x38   : > { %501 = dma.hbm_to_vmem [thread:$0]  (!%p819_p4), %s180_s27, 128, %s182_s8, %s170_s9, %s725_s11, %s725_s11, %s726_s20  }
  0x39   : > { %193 = sbr.rel (%p809_p13) target bundleno = 143 (0x8f), region = 32  ;;  %s860_s4 = sand.u32 (!%p809_p13), 1, %s704_s13  }
  0x3a   : > { %s449_s18 = sshll.u32 (!%p809_p13), %s860_s4, 3  ;;  %s196_s1 = scalar_lea.sflag (!%p809_p13), [#allocation3], %s860_s4 }
  0x3b   : > { %s199_s26 = scalar_lea.vmem (!%p809_p13), [#allocation2], %s449_s18 }
  0x3e   : > { %683 = dma.done.wait (%p794_p7), %s196_s1, 128  }
  0x3f   : > { %685 = vsyncadd (%p794_p7), %s196_s1, 4294967168 }
  0x40   : > { %687 = dma.done.wait (%p788_p3), [#allocation5], 64  }
  0x41   : > { %689 = vsyncadd (%p788_p3), [#allocation5], 4294967232 }
  0x42   : > { %691 = dma.done.wait (%p788_p3), [#allocation6], 16  }
  0x43   : > { %693 = vsyncadd (%p788_p3), [#allocation6], 4294967280 }
  0x44   : > { %212 = sfence }
  0x45   : > { %s238_s25 = sld [smem:[#allocation7]]  ;;  %v231_v0 = vld [vmem:[%s199_s26] sm:$0x3]  ;;  %v452_v1 = vld [vmem:[%s199_s26 + $0x2] sm:$0x3]  ;;  %s477_s1 = smul.u32 6, %s860_s4 }
  0x46   : > { %s455_s29 = sld [smem:[#allocation7 + $0x1]]  ;;  %v453_v2 = vld [vmem:[%s199_s26 + $0x4] sm:$0x3]  ;;  %v454_v4 = vld [vmem:[%s199_s26 + $0x6] sm:$0x3]  ;;  %p951_p7 = scmp.ne.s32.totalorder %s945_s23, 0 }
  0x47   : > { %s456_s27 = sld [smem:[#allocation7 + $0x2]]  ;;  %s230_s26 = scalar_lea.vmem [#allocation9], %s477_s1 }
  0x48   : > { %s457_s6 = sld [smem:[#allocation7 + $0x3]] }
  0x49   : > { %s876_s22 = sld [smem:[#allocation8]] }
  0x4a   : > { %s459_s7 = sld [smem:[#allocation7 + $0x80]] }
  0x4b   : > { %v239_v3 = vstv %s238_s25  ;;  %s460_s8 = sld [smem:[#allocation7 + $0x81]]  ;;  %s330_s25 = sshll.u32 %s230_s26, 4  ;;  %s884_s25 = int_to_ptr.vmem [resolvable:$true] %s330_s25 }
  0x4c   : > { %v240_v5 = vmul.f32 %v239_v3, %v231_v0  ;;  %v242_v6 = vstv %s455_s29  ;;  %s461_s9 = sld [smem:[#allocation7 + $0x82]]  ;;  %s478_s29 = smul.u32 96, %s712_s15 }
  0x4d   : > { %v243_v7 = vmul.f32 %v452_v1, %v242_v6  ;;  %v246_v8 = vstv %s456_s27  ;;  %s462_s21 = sld [smem:[#allocation7 + $0x83]]  ;;  %s727_s15 = smov [#allocation9]  }
  0x4e   : > { %v247_v9 = vmul.f32 %v453_v2, %v246_v8  ;;  %v250_v10 = vstv %s457_s6  ;;  %s878_s28 = sld [smem:[#allocation8 + $0x1]] }
  0x4f   : > { %v244_v11 = vadd.f32 %v243_v7, %v240_v5  ;;  %v251_v12 = vmul.f32 %v454_v4, %v250_v10  ;;  %s466_s10 = sld [smem:[#allocation7 + $0x100]]  ;;  %v254_v17 = vstv %s876_s22  ;;  %s889_s22 = scalar_lea.hbm %s940_s3, %s478_s29 }
  0x50   : > { %v264_v13 = vstv %s459_s7  ;;  %s467_s19 = sld [smem:[#allocation7 + $0x101]]  ;;  %s316_s7 = scalar_lea.sflag [#allocation4], %s860_s4 }
  0x51   : > { %v248_v14 = vadd.f32 %v247_v9, %v244_v11  ;;  %v265_v15 = vmul.f32 %v264_v13, %v231_v0  ;;  %v267_v16 = vstv %s460_s8  ;;  %s468_s11 = sld [smem:[#allocation7 + $0x102]]  ;;  %s632_s8 = scalar_lea.vmem %s884_s25, 96 }
  0x52   : > { %v268_v18 = vmul.f32 %v452_v1, %v267_v16  ;;  %v271_v19 = vstv %s461_s9  ;;  %s469_s20 = sld [smem:[#allocation7 + $0x103]]  ;;  %p633_p3 = scmp.ne.s32.totalorder %s884_s25, %s632_s8 }
  0x53   : > { %v252_v20 = vadd.f32 %v251_v12, %v248_v14  ;;  %v272_v21 = vmul.f32 %v453_v2, %v271_v19  ;;  %v275_v22 = vstv %s462_s21  ;;  %s470_s18 = sld [smem:[#allocation8 + $0x2]]  ;;  %s636_s9 = sshll.u32 %s727_s15, 4  ;;  %s637_s9 = int_to_ptr.vmem [resolvable:$false] %s636_s9 }
  0x54   : > { %v269_v23 = vadd.f32 %v268_v18, %v265_v15  ;;  %v276_v24 = vmul.f32 %v454_v4, %v275_v22  ;;  %v279_v31 = vstv %s878_s28  ;;  %p634_p13 = pnand %p633_p3, %p951_p7  ;;  %s638_s21 = scalar_lea.vmem %s637_s9, 192 }
  0x55   : > { %v255_v25 = vadd.f32 %v254_v17, %v252_v20  ;;  %v290_v26 = vstv %s466_s10  ;;  %p639_p0 = scmp.lt.s32.totalorder %s884_s25, %s637_s9  ;;  %p640_p9 = scmp.lt.s32.totalorder %s638_s21, %s632_s8 }
  0x56   : > { %v273_v27 = vadd.f32 %v272_v21, %v269_v23  ;;  %v291_v28 = vmul.f32 %v290_v26, %v231_v0  ;;  %v293_v29 = vstv %s467_s19  ;;  %p635_p4 = pneg %p634_p13 }
  0x57   : > { %v458_v30 = vmul.f32 -1.442695, %v255_v25  ;;  %v294_v32 = vmul.f32 %v452_v1, %v293_v29  ;;  %v297_v33 = vstv %s468_s11  ;;  %p641_p12 = por %p640_p9, %p639_p0 }
  0x58   : > { %v277_v34 = vadd.f32 %v276_v24, %v273_v27  ;;  %v298_v35 = vmul.f32 %v453_v2, %v297_v33  ;;  %v301_v36 = vstv %s469_s20 }
  0x59   : > { %566 = vpow2.f32 %v458_v30  ;;  %v295_v37 = vadd.f32 %v294_v32, %v291_v28  ;;  %v302_v38 = vmul.f32 %v454_v4, %v301_v36  ;;  %v305_v42 = vstv %s470_s18  ;;  %p642_p2 = pnand %p641_p12, %p635_p4 }
  0x5a   : > { %v280_v39 = vadd.f32 %v279_v31, %v277_v34 }
  0x5b   : > { %v299_v40 = vadd.f32 %v298_v35, %v295_v37 }
  0x5c   : > { %v464_v41 = vmul.f32 -1.442695, %v280_v39 }
  0x5d   : > { %v303_v43 = vadd.f32 %v302_v38, %v299_v40 }
  0x5e   : > { %568 = vpow2.f32 %v464_v41 }
  0x5f   : > { %v306_v44 = vadd.f32 %v305_v42, %v303_v43 }
  0x61   : > { %v471_v45 = vmul.f32 -1.442695, %v306_v44 }
  0x63   : > { %570 = vpow2.f32 %v471_v45 }
  0x66   : > { %v567_v46 = vpop.eup %566 }
  0x67   : > { %v259_v47 = vadd.f32 1.0, %v567_v46 }
  0x69   : > { %572 = vrcp.f32 %v259_v47 }
  0x6b   : > { %v569_v48 = vpop.eup %568 }
  0x6c   : > { %v284_v49 = vadd.f32 1.0, %v569_v48 }
  0x6e   : > { %574 = vrcp.f32 %v284_v49 }
  0x70   : > { %v571_v50 = vpop.eup %570 }
  0x71   : > { %v310_v51 = vadd.f32 1.0, %v571_v50 }
  0x73   : > { %576 = vrcp.f32 %v310_v51 }
  0x76   : > { %v573_v52 = vpop.eup %572 }
  0x77   : > { %262 = vst [vmem:[%s230_s26] sm:$0x3] %v573_v52 }
  0x7b   : > { %v575_v53 = vpop.eup %574 }
  0x7c   : > { %465 = vst [vmem:[%s230_s26 + $0x2] sm:$0x3] %v575_v53 }
  0x80   : > { %v577_v54 = vpop.eup %576 }
  0x81   : > { %472 = vst [vmem:[%s230_s26 + $0x4] sm:$0x3] %v577_v54 }
  0x82   : > { %645 = shalt.err (!%p642_p2)
}
  0x83   : > { %s646_s28 = scalar_lea.hbm %s889_s22, 96  ;;  %s650_s11 = scalar_lea.hbm %s940_s3, 192 }
  0x84   : > { %p647_p8 = scmp.ne.s32.totalorder %s889_s22, %s646_s28  ;;  %p651_p10 = scmp.lt.s32.totalorder %s889_s22, %s940_s3 }
  0x85   : > { %p652_p11 = scmp.lt.s32.totalorder %s650_s11, %s646_s28 }
  0x86   : > { %p648_p5 = pnand %p647_p8, %p951_p7 }
  0x87   : > { %p653_p1 = por %p652_p11, %p651_p10 }
  0x88   : > { %p649_p6 = pneg %p648_p5 }
  0x8a   : > { %p654_p3 = pnand %p653_p1, %p649_p6 }
  0x8c   : > { %657 = shalt.err (!%p654_p3)
}
  0x8d   : > { %s728_s1 = smov 32   ;;  %s729_s26 = smov 2  }
  0x8e   : > { %489 = dma.vmem_to_hbm [thread:$0]  (%p951_p7), %s884_s25, 96, %s889_s22, %s316_s7, %s728_s1, %s728_s1, %s729_s26  }
  0x8f PF: > { %s345_s29 = sand.u32 1, %s700_s12   ;;  %p952_p13 = scmp.ne.s32.totalorder %s946_s24, 0 }
  0x90   : > { %p953_p4 = scmp.ge.s32.totalorder %s720_s17, 2  ;;  %s346_s27 = scalar_lea.sflag [#allocation4], %s345_s29 }
  0x92   : > { %p503_p0 = pnand %p953_p4, %p952_p13 }
  0x94   : > { %p504_p9 = pneg %p503_p0 }
  0x96   : > { %695 = dma.done.wait (%p504_p9), %s346_s27, 96  }
  0x97   : > { %697 = vsyncadd (%p504_p9), %s346_s27, 4294967200  ;;  %s21_s17 = sadd.s32 1, %s720_s17   ;;  %s954_s12 = smov %s704_s13 }
  0x98   : > { %p18_p12 = scmp.ge.s32.totalorder %s21_s17, 4   ;;  %s955_s13 = smov %s708_s14 }
  0x99   : > { %s956_s14 = smov %s851_s30  ;;  %s957_s15 = smov %s716_s16 }
  0x9a   : > { %s958_s16 = smov %s960_s5  ;;  %20 = sbr.rel (!%p18_p12) target bundleno = 10 (0xa), region = 92 }
  0x9f   :  { %351 = vsyncpa [#allocation3], 1 }
  0xa0   :  { %353 = vsyncpa [#allocation3 + $0x1], 1 }
  0xa1   :  { %354 = vsyncpa [#allocation4], 1 }
  0xa2   :  { %356 = vsyncpa [#allocation4 + $0x1], 1 }
  0xa3   :  { %357 = vsyncpa [#allocation5], 1 }
  0xa4   :  { %359 = vsyncpa [#allocation5 + $0x1], 1 }
  0xa5   :  { %360 = vsyncpa [#allocation6], 1 }
  0xa6   :  { %362 = vsyncpa [#allocation6 + $0x1], 1 }

</bundles_post_ra>
